<compile_context>
chip_gen: v7x
topology: tpu7x:2x2x1
jax: 0.10.0
libtpu: 0.0.40
codegen_flags: <defaults>
</compile_context>

<pallas_src>
import functools

import numpy as np
import jax
import jax.numpy as jnp
from jax import lax
from jax.experimental import pallas as pl
from jax.experimental.pallas import tpu as pltpu


def _ceil_div(a, b):
    return -(-a // b)


# ----------------------------- Pallas kernel -----------------------------

def warp_kernel(x_ref, pos_ref, out_ref, *, K, R, C, block_s):
    # x_ref:   (1, C*R, K)      bf16 image; rows m = c*R + r, lanes = contracted dim
    # pos_ref: (1, 2, block_s)  f32 sample coords: [along-K coord, along-R coord]
    # out_ref: (1, C, block_s)  f32 warped output tile (lane-dense)
    pos = pos_ref[0]                                   # (2, S_blk)
    ks = pos[0:1, :]                                   # (1, S_blk)
    rs = pos[1:2, :]                                   # (1, S_blk)

    # Separable triangle weights; out-of-range taps get weight 0 (zero padding).
    q = lax.broadcasted_iota(jnp.int32, (K, 1), 0).astype(jnp.float32)
    r = lax.broadcasted_iota(jnp.int32, (R, 1), 0).astype(jnp.float32)
    wkT = jnp.maximum(0.0, 1.0 - jnp.abs(ks - q))      # (K, S_blk)
    wrT = jnp.maximum(0.0, 1.0 - jnp.abs(rs - r))      # (R, S_blk)

    # Stage 1 (MXU, bf16 inputs, f32 accumulation): contract the K axis for all
    # (c, r) rows at once.
    big = jnp.dot(x_ref[0], wkT.astype(jnp.bfloat16),
                  preferred_element_type=jnp.float32)  # (C*R, S_blk)

    # Stage 2 (VPU multiply + XLU sublane reduce): weight by wr and reduce over
    # the R axis.  R % 8 == 0, so the reshape is a free sublane view.
    out = (big.reshape(C, R, block_s) * wrT[None, :, :]).sum(axis=1)
    out_ref[0] = out.astype(out_ref.dtype)             # (C, S_blk)


# ----------------------------- wrapper -----------------------------

def _plan_spatial_tiling(S, K, R, C, vmem_budget_bytes=32 * 1024 * 1024):
    """Pick a lane tile (multiple of 128) whose working set fits the VMEM budget."""
    x_resident = 2 * (C * R * K * 2)                     # bf16 image, double-buffered
    budget = max(vmem_budget_bytes - x_resident, 1 << 20)
    # bytes that scale with block_s: wkT(f32+bf16) + wrT + big + 2x(out + pos)
    per_lane = 6 * K + 4 * R + 4 * C * R + 2 * (4 * C + 8)
    bs_max = max(128, min(budget // per_lane, 4096))
    bs_max = (bs_max // 128) * 128
    n_tiles = max(1, _ceil_div(S, bs_max))
    block_s = _ceil_div(_ceil_div(S, n_tiles), 128) * 128
    return block_s, n_tiles * block_s


def spatial_transformer(x, flow):
    """Pallas equivalent of SpatialTransformer(size=(H, W), mode='linear')(x, flow)."""
    B, C, H, W = x.shape
    Bf, Cf, Hf, Wf = flow.shape
    assert (Bf, Hf, Wf) == (B, H, W) and Cf == 2, "flow must be (B, 2, H, W) matching x"
    S = H * W

    # Absolute sample coordinates (grid + flow), computed once in the wrapper.
    flow_f = flow.astype(jnp.float32)
    ii = jnp.arange(H, dtype=jnp.float32)[None, :, None]
    jj = jnp.arange(W, dtype=jnp.float32)[None, None, :]
    ys = ii + flow_f[:, 0]                               # (B, H, W) sample rows
    xs = jj + flow_f[:, 1]                               # (B, H, W) sample cols

    contract_w = W >= H                                  # contract the larger dim on the MXU
    if contract_w:
        K, Rn = W, H
        x_arr = x
        pos = jnp.stack([xs, ys], axis=1)                # [K-coord, R-coord]
    else:
        K, Rn = H, W
        x_arr = jnp.swapaxes(x, 2, 3)                    # (B, C, W, H)
        pos = jnp.stack([ys, xs], axis=1)

    # Pad the stage-2 axis to a sublane multiple (padded rows are zero -> no effect).
    R_pad = _ceil_div(Rn, 8) * 8
    if R_pad != Rn:
        x_arr = jnp.pad(x_arr, ((0, 0), (0, 0), (0, R_pad - Rn), (0, 0)))
    x_r = x_arr.reshape(B, C * R_pad, K).astype(jnp.bfloat16)

    block_s, S_pad = _plan_spatial_tiling(S, K, R_pad, C)
    pos = pos.reshape(B, 2, S)
    if S_pad != S:
        # Padded pixels get coordinate -2 -> every tap weight is 0 -> output 0.
        pos = jnp.pad(pos, ((0, 0), (0, 0), (0, S_pad - S)), constant_values=-2.0)

    kern = functools.partial(warp_kernel, K=K, R=R_pad, C=C, block_s=block_s)

    out = pl.pallas_call(
        kern,
        out_shape=jax.ShapeDtypeStruct((B, C, S_pad), jnp.float32),
        grid=(B, S_pad // block_s),
        in_specs=[
            pl.BlockSpec((1, C * R_pad, K), lambda b, t: (b, 0, 0)),   # image (resident per batch)
            pl.BlockSpec((1, 2, block_s), lambda b, t: (b, 0, t)),     # sample-coordinate tile
        ],
        out_specs=pl.BlockSpec((1, C, block_s), lambda b, t: (b, 0, t)),
        compiler_params=pltpu.CompilerParams(
            dimension_semantics=("parallel", "parallel"),
            vmem_limit_bytes=48 * 1024 * 1024),
    )(x_r, pos)

    return out[:, :, :S].reshape(B, C, H, W).astype(x.dtype)


# ------------------- plain-JAX reference (sanity check) -------------------

def _bilinear_sample(img, y, x, H, W):
    y0 = jnp.floor(y).astype(jnp.int32)
    x0 = jnp.floor(x).astype(jnp.int32)
    y1 = y0 + 1
    x1 = x0 + 1
    wy1 = y - y0
    wy0 = 1.0 - wy1
    wx1 = x - x0
    wx0 = 1.0 - wx1

    def get(p, q):
        valid = (p >= 0) & (p < H) & (q >= 0) & (q < W)
        pc = jnp.clip(p, 0, H - 1)
        qc = jnp.clip(q, 0, W - 1)
        return jnp.where(valid, img[pc, qc], 0.0)

    return (wy0 * wx0 * get(y0, x0) + wy0 * wx1 * get(y0, x1)
            + wy1 * wx0 * get(y1, x0) + wy1 * wx1 * get(y1, x1))


def ref_spatial_transformer(x, flow):
    B, C, H, W = x.shape
    ii = jnp.arange(H, dtype=jnp.float32).reshape(H, 1)
    jj = jnp.arange(W, dtype=jnp.float32).reshape(1, W)
    outs = []
    for b in range(B):
        y = ii + flow[b, 0]
        xx = jj + flow[b, 1]
        outs.append(jnp.stack(
            [_bilinear_sample(x[b, c], y, xx, H, W) for c in range(C)], axis=0))
    return jnp.stack(outs, axis=0)


# ----------------------------- main -----------------------------

if __name__ == "__main__":
    B, C, H, W = 2, 4, 16, 16

    key = jax.random.PRNGKey(0)
    kx, kf = jax.random.split(key)
    x = jax.random.normal(kx, (B, C, H, W), dtype=jnp.float32)
    flow = 3.0 * jax.random.normal(kf, (B, 2, H, W), dtype=jnp.float32)

    out = spatial_transformer(x, flow)
    out = jax.block_until_ready(out)

    ref = ref_spatial_transformer(x, flow)
    assert out.shape == x.shape
    # bf16 MXU multiplies (image & x-axis weights) with f32 accumulation => a few
    # 1e-3..1e-2 of absolute error vs the pure-f32 reference is expected.
    np.testing.assert_allclose(np.asarray(out), np.asarray(ref), atol=5e-2, rtol=5e-2)

    print("KERNEL_OK")
</pallas_src>

<mosaic_0001>
module attributes {stable_mosaic.version = 11 : i64} {
  func.func @warp_kernel(%arg0: i32, %arg1: i32, %arg2: memref<1x64x16xbf16, #tpu.memory_space<vmem>>, %arg3: memref<1x2x256xf32, #tpu.memory_space<vmem>>, %arg4: memref<1x4x256xf32, #tpu.memory_space<vmem>>) attributes {dimension_semantics = [#tpu.dimension_semantics<parallel>, #tpu.dimension_semantics<parallel>], iteration_bounds = array<i64: 2, 1>, scalar_prefetch = 0 : i64, scratch_operands = 0 : i64, tpu.core_type = #tpu.core_type<tc>, window_params = [{transform_indices = @transform_0, window_bounds = array<i64: 1, 64, 16>}, {transform_indices = @transform_1, window_bounds = array<i64: 1, 2, 256>}, {transform_indices = @transform_2, window_bounds = array<i64: 1, 4, 256>}]} {
    %c0 = arith.constant 0 : index
    %c0_0 = arith.constant 0 : index
    %c0_1 = arith.constant 0 : index
    %0 = vector.load %arg3[%c0, %c0_0, %c0_1] : memref<1x2x256xf32, #tpu.memory_space<vmem>>, vector<1x2x256xf32>
    %1 = vector.shape_cast %0 : vector<1x2x256xf32> to vector<2x256xf32>
    %2 = vector.extract_strided_slice %1 {offsets = [0, 0], sizes = [1, 256], strides = [1, 1]} : vector<2x256xf32> to vector<1x256xf32>
    %3 = vector.extract_strided_slice %1 {offsets = [1, 0], sizes = [1, 256], strides = [1, 1]} : vector<2x256xf32> to vector<1x256xf32>
    %4 = tpu.iota {dimensions = array<i32: 0>} : vector<16x1xi32>
    %5 = arith.sitofp %4 : vector<16x1xi32> to vector<16x1xf32>
    %6 = tpu.iota {dimensions = array<i32: 0>} : vector<16x1xi32>
    %7 = arith.sitofp %6 : vector<16x1xi32> to vector<16x1xf32>
    %8 = vector.broadcast %2 : vector<1x256xf32> to vector<16x256xf32>
    %9 = vector.broadcast %5 : vector<16x1xf32> to vector<16x256xf32>
    %10 = arith.subf %8, %9 : vector<16x256xf32>
    %11 = math.absf %10 : vector<16x256xf32>
    %cst = arith.constant 1.000000e+00 : f32
    %12 = vector.broadcast %cst : f32 to vector<16x256xf32>
    %13 = arith.subf %12, %11 : vector<16x256xf32>
    %cst_2 = arith.constant 0.000000e+00 : f32
    %14 = vector.broadcast %cst_2 : f32 to vector<16x256xf32>
    %15 = arith.maximumf %14, %13 : vector<16x256xf32>
    %16 = vector.broadcast %3 : vector<1x256xf32> to vector<16x256xf32>
    %17 = vector.broadcast %7 : vector<16x1xf32> to vector<16x256xf32>
    %18 = arith.subf %16, %17 : vector<16x256xf32>
    %19 = math.absf %18 : vector<16x256xf32>
    %cst_3 = arith.constant 1.000000e+00 : f32
    %20 = vector.broadcast %cst_3 : f32 to vector<16x256xf32>
    %21 = arith.subf %20, %19 : vector<16x256xf32>
    %cst_4 = arith.constant 0.000000e+00 : f32
    %22 = vector.broadcast %cst_4 : f32 to vector<16x256xf32>
    %23 = arith.maximumf %22, %21 : vector<16x256xf32>
    %c0_5 = arith.constant 0 : index
    %c0_6 = arith.constant 0 : index
    %c0_7 = arith.constant 0 : index
    %24 = vector.load %arg2[%c0_5, %c0_6, %c0_7] : memref<1x64x16xbf16, #tpu.memory_space<vmem>>, vector<1x64x16xbf16>
    %25 = vector.shape_cast %24 : vector<1x64x16xbf16> to vector<64x16xbf16>
    %26 = arith.truncf %15 : vector<16x256xf32> to vector<16x256xbf16>
    %cst_8 = arith.constant dense<0.000000e+00> : vector<64x256xf32>
    %27 = tpu.matmul %25, %26, %cst_8 {dimension_numbers = #tpu.dot_dimension_numbers<[1], [0], [0], [1], [0, 0, 1, 1], [], []>} : vector<64x16xbf16>, vector<16x256xbf16>, vector<64x256xf32> -> vector<64x256xf32>
    %28 = vector.shape_cast %27 : vector<64x256xf32> to vector<4x16x256xf32>
    %29 = vector.shape_cast %23 : vector<16x256xf32> to vector<1x16x256xf32>
    %30 = vector.broadcast %29 : vector<1x16x256xf32> to vector<4x16x256xf32>
    %31 = arith.mulf %28, %30 : vector<4x16x256xf32>
    %cst_9 = arith.constant dense<0.000000e+00> : vector<4x256xf32>
    %32 = vector.multi_reduction <add>, %31, %cst_9 [1] : vector<4x16x256xf32> to vector<4x256xf32>
    %c0_10 = arith.constant 0 : index
    %c0_11 = arith.constant 0 : index
    %c0_12 = arith.constant 0 : index
    %33 = vector.load %arg4[%c0_10, %c0_11, %c0_12] : memref<1x4x256xf32, #tpu.memory_space<vmem>>, vector<1x4x256xf32>
    %34 = vector.shape_cast %33 : vector<1x4x256xf32> to vector<4x256xf32>
    %35 = vector.shape_cast %32 : vector<4x256xf32> to vector<1x4x256xf32>
    tpu.vector_store %arg4[%c0_10, %c0_11, %c0_12], %35 {strides = array<i32>} : memref<1x4x256xf32, #tpu.memory_space<vmem>>, vector<1x4x256xf32>,
    return
  }
  func.func @transform_0(%arg0: i32, %arg1: i32) -> (i32, i32, i32) {
    %c0_i32 = arith.constant 0 : i32
    %c0_i32_0 = arith.constant 0 : i32
    %c0_i32_1 = arith.constant 0 : i32
    return %arg0, %c0_i32, %c0_i32_0 : i32, i32, i32
  }
  func.func @transform_1(%arg0: i32, %arg1: i32) -> (i32, i32, i32) {
    %c0_i32 = arith.constant 0 : i32
    %c0_i32_0 = arith.constant 0 : i32
    return %arg0, %c0_i32, %arg1 : i32, i32, i32
  }
  func.func @transform_2(%arg0: i32, %arg1: i32) -> (i32, i32, i32) {
    %c0_i32 = arith.constant 0 : i32
    %c0_i32_0 = arith.constant 0 : i32
    return %arg0, %c0_i32, %arg1 : i32, i32, i32
  }
}

</mosaic_0001>

<bundles_post_ra>
// kernel: tpu_custom_call.1
= control target key start
LH: loop header
LB: loop body
LE: loop exit
PB: predicated region body
PF: predicated region fallthrough
CT: control target
= control target key end

     0   :  { %7 = vsyncpa [#allocation3], 0  ;;  %s897_s0 = inlined_call_operand.vmem [shape: bf16[2,64,16], index: 0, kind: input, shape index: {}]   ;;  %s898_s1 = inlined_call_operand.vmem [shape: f32[2,2,256], index: 1, kind: input, shape index: {}]   ;;  %s899_s2 = inlined_call_operand.hbm [shape: f32[2,4,256], index: 2, kind: output, shape index: {}]  }
   0x1   :  { %9 = vsyncpa [#allocation3 + $0x1], 0  ;;  %s776_s9 = smov 0   ;;  %s778_s10 = smov 0  }
   0x2   :  { %s780_s11 = smov 0   ;;  %s782_s12 = smov 0  }
   0x3   :  { %s784_s13 = smov 0   ;;  %s786_s14 = smov 0  }
   0x4 LB: > { %s591_s15 = sadd.s32 4294967295, %s757_s14   ;;  %s592_s16 = sadd.s32 4294967294, %s757_s14   ;;  %s757_s14 = sphi %s786_s14, %s15_s14   ;;  %s753_s13 = sphi %s784_s13, %s906_s13   ;;  %s749_s12 = sphi %s782_s12, %s905_s12   ;;  %s745_s11 = sphi %s780_s11, %s904_s11   ;;  %s741_s10 = sphi %s778_s10, %s903_s10   ;;  %s737_s9 = sphi %s776_s9, %s902_s9  }
   0x5   : > { %s27_s17 = sadd.s32 1, %s753_s13  ;;  %s90_s18 = sadd.s32 1, %s745_s11 }
   0x6   : > { %p29_p0 = scmp.ge.s32.totalorder %s27_s17, 2  ;;  %p100_p1 = scmp.ne.s32.totalorder %s745_s11, %s741_s10 }
   0x7   : > { %p101_p2 = scmp.eq.s32.totalorder %s591_s15, 1  ;;  %p106_p3 = scmp.ne.s32.totalorder %s741_s10, %s737_s9 }
   0x8   : > { %s908_s17 = smov (%p29_p0, %s27_s17), 0  ;;  %p107_p5 = scmp.eq.s32.totalorder %s592_s16, 1 }
   0x9   : > { %p816_p4 = por %p101_p2, %p100_p1  ;;  %s85_s20 = ssub.s32 %s753_s13, %s908_s17 }
   0xa   : > { %p595_p6 = scmp.ge.s32.totalorder %s757_s14, 1  ;;  %p88_p7 = scmp.eq.s32.totalorder %s85_s20, 0 }
   0xb   : > { %p823_p8 = por %p107_p5, %p106_p3  ;;  %p146_p9 = scmp.lt.s32.totalorder %s757_s14, 3 }
   0xc   : > { %s829_s22 = scalar_select %p88_p7, %s745_s11, %s90_s18  }
   0xd   : > { %p147_p10 = pnand %p595_p6, %p146_p9 }
   0xe   : > { %p177_p11 = scmp.lt.s32.totalorder (!%p147_p10), %s749_s12, 1  ;;  %v195_v0 = vlaneseq (!%p147_p10)  ;;  %v759_v1 = vmov (!%p147_p10), 0   ;;  %vm299_vm0 = vcmask (!%p147_p10), 130048   ;;  %s174_s4 = sand.u32 (!%p147_p10), 1, %s741_s10   ;;  %vm470_vm1 = vcmask (!%p147_p10), 1041409  }
   0xf   : > { %150 = sbr.rel (%p147_p10) target bundleno = 308 (0x134), region = 28  ;;  %344 = vmatprep.mubr.bf16.mxu0 (!%p147_p10), %v759_v1  ;;  %364 = vmatprep.mubr.bf16.mxu1 (!%p147_p10), %v759_v1  ;;  %s596_s5 = sshll.u32 (!%p147_p10), %s174_s4, 3  ;;  %vm472_vm2 = vcmask (!%p147_p10), 1045509   ;;  %vm475_vm3 = vcmask (!%p147_p10), 1042434   ;;  %vm477_vm4 = vcmask (!%p147_p10), 1046534   ;;  %vm480_vm5 = vcmask (!%p147_p10), 1043459  }
  0x10   : > { %v196_v2 = vshrl.u32 (!%p147_p10), %v195_v0, 7  ;;  %s616_s6 = sshll.u32 (!%p147_p10), %s749_s12, 7  ;;  %s176_s7 = scalar_lea.vmem (!%p147_p10), [#allocation2], %s596_s5  ;;  %vm482_vm6 = vcmask (!%p147_p10), 1047559  }
  0x11   : > { %s503_s8 = sshll.u32 (!%p147_p10), %s176_s7, 4  ;;  %s850_s18 = scalar_lea.hbm (!%p147_p10), %s899_s2, %s616_s6  ;;  %s852_s8 = int_to_ptr.vmem [resolvable:$true] %s503_s8 }
  0x12   : > { %v197_v3 = vadd.s32 (!%p147_p10), 8, %v196_v2  ;;  %v203_v4 = vsub.s32 (!%p147_p10), 0, %v196_v2  ;;  %v207_v5 = vsub.s32 (!%p147_p10), 2, %v196_v2  ;;  %v198_v7 = vcvt.s32.f32 (!%p147_p10), %v196_v2  ;;  %s679_s20 = scalar_lea.vmem (!%p147_p10), %s852_s8, 128 }
  0x13   : > { %v237_v35 = vsub.s32 (!%p147_p10), 1, %v196_v2  ;;  %v241_v36 = vsub.s32 (!%p147_p10), 3, %v196_v2  ;;  %p680_p12 = scmp.ne.s32.totalorder (!%p147_p10), %s852_s8, %s679_s20 }
  0x14   : > { %v199_v8 = vcvt.s32.f32 (!%p147_p10), %v197_v3 }
  0x15   : > { %p681_p13 = pnand (!%p147_p10), %p680_p12, %p816_p4 }
  0x16   : > { %s178_s23 = scalar_select %p177_p11, %s749_s12, 1 }
  0x17   : > { %s487_s12 = scalar_lea.sflag [#allocation3], %s174_s4  ;;  %p682_p0 = pneg %p681_p13 }
  0x18   : > { %s614_s24 = sshll.u32 %s178_s23, 5  ;;  %s615_s25 = sshll.u32 %s178_s23, 2 }
  0x19   : > { %s836_s28 = scalar_lea.vmem %s897_s0, %s614_s24  ;;  %s190_s3 = scalar_lea.vmem %s898_s1, %s615_s25 }
  0x1a   : > { %v194_v6 = vld [vmem:[%s190_s3] sm:$0xf]  ;;  %v676_v32 = vld [vmem:[%s836_s28 + $0x10] sm:$0xff]   ;;  %v677_v33 = vld [vmem:[%s836_s28 + $0x8] sm:$0xff]   ;;  %s760_s23 = smov [#allocation2]  }
  0x1b   : > { %v208_v9 = vrot.slane %v194_v6, %v207_v5  ;;  %v204_v10 = vrot.slane %v194_v6, %v203_v4  ;;  %v675_v31 = vld [vmem:[%s836_s28] sm:$0xff]   ;;  %v678_v34 = vld [vmem:[%s836_s28 + $0x18] sm:$0xff]   ;;  %v238_v37 = vrot.slane %v194_v6, %v237_v35  ;;  %v242_v38 = vrot.slane %v194_v6, %v241_v36  ;;  %s683_s24 = sshll.u32 %s760_s23, 4  ;;  %s684_s24 = int_to_ptr.vmem [resolvable:$false] %s683_s24 }
  0x1c   : > { %s685_s25 = scalar_lea.vmem %s684_s24, 256  ;;  %p686_p1 = scmp.lt.s32.totalorder %s852_s8, %s684_s24 }
  0x1d   : > { %v218_v11 = vrot.slane %v208_v9, %v203_v4  ;;  %v214_v12 = vrot.slane %v204_v10, %v203_v4  ;;  %v248_v39 = vrot.slane %v238_v37, %v237_v35  ;;  %v252_v40 = vrot.slane %v242_v38, %v237_v35  ;;  %p687_p2 = scmp.lt.s32.totalorder %s685_s25, %s679_s20 }
  0x1f   : > { %v220_v13 = vsub.f32 %v218_v11, %v198_v7  ;;  %v222_v14 = vsub.f32 %v218_v11, %v199_v8  ;;  %v219_v15 = vsub.f32 %v214_v12, %v198_v7  ;;  %v221_v16 = vsub.f32 %v214_v12, %v199_v8  ;;  %p688_p3 = por %p687_p2, %p686_p1 }
  0x20   : > { %v253_v41 = vsub.f32 %v248_v39, %v198_v7  ;;  %v255_v42 = vsub.f32 %v248_v39, %v199_v8  ;;  %v254_v43 = vsub.f32 %v252_v40, %v198_v7  ;;  %v256_v44 = vsub.f32 %v252_v40, %v199_v8 }
  0x21   : > { %v224_v17 = vand.u32 2147483647, %v220_v13  ;;  %v226_v18 = vand.u32 2147483647, %v222_v14  ;;  %v223_v19 = vand.u32 2147483647, %v219_v15  ;;  %p689_p5 = pnand %p688_p3, %p682_p0 }
  0x22   : > { %v225_v20 = vand.u32 2147483647, %v221_v16  ;;  %v257_v45 = vand.u32 2147483647, %v253_v41  ;;  %v259_v46 = vand.u32 2147483647, %v255_v42 }
  0x23   : > { %v228_v21 = vsub.f32 1.0, %v224_v17  ;;  %v230_v22 = vsub.f32 1.0, %v226_v18  ;;  %v227_v23 = vsub.f32 1.0, %v223_v19  ;;  %v258_v47 = vand.u32 2147483647, %v254_v43 }
  0x24   : > { %v229_v24 = vsub.f32 1.0, %v225_v20  ;;  %v260_v48 = vand.u32 2147483647, %v256_v44  ;;  %v261_v49 = vsub.f32 1.0, %v257_v45  ;;  %v263_v50 = vsub.f32 1.0, %v259_v46 }
  0x25   : > { %v232_v25 = vmax.f32 %v228_v21, 0.0  ;;  %v234_v26 = vmax.f32 %v230_v22, 0.0  ;;  %v231_v27 = vmax.f32 %v227_v23, 0.0  ;;  %v262_v51 = vsub.f32 1.0, %v258_v47 }
  0x26   : > { %v233_v28 = vmax.f32 %v229_v24, 0.0  ;;  %v264_v52 = vsub.f32 1.0, %v260_v48  ;;  %v265_v53 = vmax.f32 %v261_v49, 0.0  ;;  %v267_v54 = vmax.f32 %v263_v50, 0.0 }
  0x27   : > { %v278_v29 = vpack.c.bf16 %v234_v26, %v232_v25  ;;  %v266_v57 = vmax.f32 %v262_v51, 0.0 }
  0x28   : > { %v277_v30 = vpack.c.bf16 %v233_v28, %v231_v27  ;;  %v268_v58 = vmax.f32 %v264_v52, 0.0 }
  0x29   : > { %312 = vmatprep.subr.bf16.mxu0 %v278_v29  ;;  %617 = vmatprep.subr.bf16.mxu1 %v278_v29 }
  0x2a   : > { %313 = vmatpush1.bf16.msra.mxu0 %v277_v30  ;;  %618 = vmatpush1.bf16.msra.mxu1 %v277_v30 }
  0x2d   : > { %605 = vmatmul.mubr.msk.bf16.vlgmr.msra.gmra.mrb[0].mxu0 %vm299_vm0, %v675_v31  ;;  %607 = vmatmul.mubr.msk.bf16.vlgmr.msra.gmra.mrb[0].mxu1 %vm299_vm0, %v676_v32 }
  0x2e   : > { %354 = vmatprep.mubr.bf16.mxu0 %v759_v1  ;;  %374 = vmatprep.mubr.bf16.mxu1 %v759_v1 }
  0x35   : > { %606 = vmatmul.mubr.msk.bf16.gmra.mrb[4].mxu0 %vm299_vm0, %v677_v33  ;;  %608 = vmatmul.mubr.msk.bf16.gmra.mrb[4].mxu1 %vm299_vm0, %v678_v34 }
 0x100   : > { %v346_v55 = vpop.f32.mrb[0].mxu0  ;;  %v366_v56 = vpop.f32.mrb[0].mxu1 }
 0x101   : > { %v393_v59 = vmul.f32 %v366_v56, %v265_v53  ;;  %v348_v60 = vpop.f32.mrb[1].mxu0  ;;  %v368_v61 = vpop.f32.mrb[1].mxu1  ;;  %v385_v1 = vmul.f32 %v346_v55, %v265_v53 }
 0x102   : > { %v394_v62 = vmul.f32 %v368_v61, %v266_v57  ;;  %v350_v63 = vpop.f32.mrb[2].mxu0  ;;  %v370_v0 = vpop.f32.mrb[2].mxu1  ;;  %v386_v6 = vmul.f32 %v348_v60, %v266_v57 }
 0x103   : > { %v387_v2 = vmul.f32 %v350_v63, %v267_v54  ;;  %v395_v3 = vmul.f32 %v370_v0, %v267_v54  ;;  %v352_v4 = vpop.f32.mrb[3].mxu0  ;;  %v372_v5 = vpop.f32.mrb[3].mxu1 }
 0x104   : > { %v388_v7 = vmul.f32 %v352_v4, %v268_v58  ;;  %v396_v8 = vmul.f32 %v372_v5, %v268_v58 }
 0x105   : > { %v401_v9 = vadd.f32 %v387_v2, %v385_v1  ;;  %v429_v10 = vadd.f32 %v395_v3, %v393_v59 }
 0x106   : > { %v408_v11 = vadd.f32 %v388_v7, %v386_v6  ;;  %v436_v12 = vadd.f32 %v396_v8, %v394_v62 }
 0x107   : > { %v402_v13 = vrot.slane %v401_v9, 4  ;;  %v430_v14 = vrot.slane %v429_v10, 4 }
 0x108   : > { %v409_v15 = vrot.slane %v408_v11, 4  ;;  %v437_v16 = vrot.slane %v436_v12, 4  ;;  %v356_v17 = vpop.f32.mrb[4].mxu0  ;;  %v376_v18 = vpop.f32.mrb[4].mxu1 }
 0x109   : > { %v403_v19 = vadd.f32 %v402_v13, %v401_v9  ;;  %v431_v20 = vadd.f32 %v430_v14, %v429_v10  ;;  %v389_v21 = vmul.f32 %v356_v17, %v265_v53  ;;  %v397_v22 = vmul.f32 %v376_v18, %v265_v53  ;;  %v358_v23 = vpop.f32.mrb[5].mxu0  ;;  %v378_v24 = vpop.f32.mrb[5].mxu1 }
 0x10a   : > { %v410_v25 = vadd.f32 %v409_v15, %v408_v11  ;;  %v438_v26 = vadd.f32 %v437_v16, %v436_v12  ;;  %v390_v27 = vmul.f32 %v358_v23, %v266_v57  ;;  %v398_v28 = vmul.f32 %v378_v24, %v266_v57  ;;  %v360_v29 = vpop.f32.mrb[6].mxu0  ;;  %v380_v30 = vpop.f32.mrb[6].mxu1 }
 0x10b   : > { %v404_v31 = vrot.slane %v403_v19, 2  ;;  %v432_v32 = vrot.slane %v431_v20, 2  ;;  %v391_v33 = vmul.f32 %v360_v29, %v267_v54  ;;  %v399_v34 = vmul.f32 %v380_v30, %v267_v54  ;;  %v362_v35 = vpop.f32.mrb[7].mxu0  ;;  %v382_v36 = vpop.f32.mrb[7].mxu1 }
 0x10c   : > { %v411_v37 = vrot.slane %v410_v25, 2  ;;  %v439_v38 = vrot.slane %v438_v26, 2  ;;  %v392_v39 = vmul.f32 %v362_v35, %v268_v58  ;;  %v400_v40 = vmul.f32 %v382_v36, %v268_v58 }
 0x10d   : > { %v405_v41 = vadd.f32 %v404_v31, %v403_v19  ;;  %v433_v42 = vadd.f32 %v432_v32, %v431_v20  ;;  %v415_v43 = vadd.f32 %v391_v33, %v389_v21  ;;  %v443_v44 = vadd.f32 %v399_v34, %v397_v22 }
 0x10e   : > { %v412_v45 = vadd.f32 %v411_v37, %v410_v25  ;;  %v440_v46 = vadd.f32 %v439_v38, %v438_v26  ;;  %v422_v47 = vadd.f32 %v392_v39, %v390_v27  ;;  %v450_v48 = vadd.f32 %v400_v40, %v398_v28 }
 0x10f   : > { %v406_v49 = vrot.slane %v405_v41, 1  ;;  %v434_v50 = vrot.slane %v433_v42, 1  ;;  %v416_v51 = vrot.slane %v415_v43, 4  ;;  %v444_v52 = vrot.slane %v443_v44, 4 }
 0x110   : > { %v413_v53 = vrot.slane %v412_v45, 1  ;;  %v441_v54 = vrot.slane %v440_v46, 1  ;;  %v423_v55 = vrot.slane %v422_v47, 4  ;;  %v451_v56 = vrot.slane %v450_v48, 4 }
 0x111   : > { %v407_v57 = vadd.f32 %v406_v49, %v405_v41  ;;  %v435_v59 = vadd.f32 %v434_v50, %v433_v42  ;;  %v417_v60 = vadd.f32 %v416_v51, %v415_v43  ;;  %v445_v58 = vadd.f32 %v444_v52, %v443_v44 }
 0x112   : > { %v414_v61 = vadd.f32 %v413_v53, %v412_v45  ;;  %v442_v62 = vadd.f32 %v441_v54, %v440_v46  ;;  %v424_v63 = vadd.f32 %v423_v55, %v422_v47  ;;  %v452_v0 = vadd.f32 %v451_v56, %v450_v48 }
 0x113   : > { %v418_v1 = vrot.slane %v417_v60, 2  ;;  %v446_v2 = vrot.slane %v445_v58, 2 }
 0x114   : > { %v465_v3 = vcombine.low %v407_v57, %v414_v61  ;;  %v467_v4 = vcombine.low %v435_v59, %v442_v62  ;;  %v425_v5 = vrot.slane %v424_v63, 2  ;;  %v453_v6 = vrot.slane %v452_v0, 2 }
 0x115   : > { %v419_v7 = vadd.f32 %v418_v1, %v417_v60  ;;  %v447_v8 = vadd.f32 %v446_v2, %v445_v58 }
 0x116   : > { %v426_v9 = vadd.f32 %v425_v5, %v424_v63  ;;  %v454_v10 = vadd.f32 %v453_v6, %v452_v0  ;;  %v474_v22 = vrot.slane %v467_v4, 6 }
 0x117   : > { %v420_v11 = vrot.slane %v419_v7, 1  ;;  %v448_v12 = vrot.slane %v447_v8, 1 }
 0x118   : > { %v427_v13 = vrot.slane %v426_v9, 1  ;;  %v455_v14 = vrot.slane %v454_v10, 1 }
 0x119   : > { %v421_v15 = vadd.f32 %v420_v11, %v419_v7  ;;  %v449_v16 = vadd.f32 %v448_v12, %v447_v8 }
 0x11a   : > { %v428_v17 = vadd.f32 %v427_v13, %v426_v9  ;;  %v456_v18 = vadd.f32 %v455_v14, %v454_v10 }
 0x11c   : > { %v466_v19 = vcombine.low %v421_v15, %v428_v17  ;;  %v468_v20 = vcombine.low %v449_v16, %v456_v18 }
 0x11e   : > { %v469_v21 = vrot.slane %v466_v19, 7  ;;  %v479_v26 = vrot.slane %v468_v20, 5 }
 0x120   : > { %v471_v23 = vsel %vm470_vm1, %v469_v21, %v465_v3 }
 0x121   : > { %v473_v24 = vsel %vm472_vm2, %v469_v21, %v471_v23 }
 0x122   : > { %v476_v25 = vsel %vm475_vm3, %v474_v22, %v473_v24 }
 0x123   : > { %v478_v27 = vsel %vm477_vm4, %v474_v22, %v476_v25 }
 0x124   : > { %v481_v28 = vsel %vm480_vm5, %v479_v26, %v478_v27 }
 0x125   : > { %v483_v29 = vsel %vm482_vm6, %v479_v26, %v481_v28 }
 0x126   : > { %485 = vst [vmem:[%s176_s7] sm:$0xff] %v483_v29 }
 0x127   : > { %692 = shalt.err (!%p689_p5)
}
 0x128   : > { %s693_s26 = scalar_lea.hbm %s850_s18, 128  ;;  %s697_s29 = scalar_lea.hbm %s899_s2, 256 }
 0x129   : > { %p694_p6 = scmp.ne.s32.totalorder %s850_s18, %s693_s26  ;;  %p698_p10 = scmp.lt.u32.totalorder %s850_s18, %s899_s2 }
 0x12a   : > { %p699_p11 = scmp.lt.u32.totalorder %s697_s29, %s693_s26  ;;  %p701_p13 = scmp.lt.u32.totalorder %s693_s26, %s850_s18 }
 0x12b   : > { %p695_p7 = pnand %p694_p6, %p816_p4 }
 0x12c   : > { %p700_p12 = por %p699_p11, %p698_p10 }
 0x12d   : > { %p696_p9 = pneg %p695_p7 }
 0x12e   : > { %p702_p0 = por %p701_p13, %p700_p12 }
 0x130   : > { %p703_p1 = pnand %p702_p0, %p696_p9 }
 0x132   : > { %706 = shalt.err (!%p703_p1)
}
 0x133   : > { %619 = dma.vmem_to_hbm [thread:$0]  (%p816_p4), %s852_s8, 128, %s850_s18, %s487_s12  }
 0x134 PF: > { %p625_p2 = scmp.ge.s32.totalorder %s757_s14, 2  ;;  %s515_s4 = sand.u32 1, %s737_s9  }
 0x135   : > { %s516_s5 = scalar_lea.sflag [#allocation3], %s515_s4 }
 0x136   : > { %p622_p3 = pnand %p625_p2, %p823_p8 }
 0x138   : > { %732 = dma.done.wait (!%p622_p3), %s516_s5, 128  }
 0x139   : > { %734 = vsyncadd (!%p622_p3), %s516_s5, 4294967168  ;;  %s15_s14 = sadd.s32 1, %s757_s14   ;;  %s902_s9 = smov %s741_s10 }
 0x13a   : > { %p12_p5 = scmp.ge.s32.totalorder %s15_s14, 4   ;;  %s903_s10 = smov %s745_s11 }
 0x13b   : > { %s904_s11 = smov %s829_s22  ;;  %s905_s12 = smov %s753_s13 }
 0x13c   : > { %s906_s13 = smov %s908_s17  ;;  %14 = sbr.rel (!%p12_p5) target bundleno = 4 (0x4), region = 66 }
 0x143   :  { %521 = vsyncpa [#allocation3], 1 }
 0x144   :  { %523 = vsyncpa [#allocation3 + $0x1], 1 }

</bundles_post_ra>
